<compile_context>
chip_gen: v5e
topology: v5e:2x2
jax: 0.10.0
libtpu: 0.0.40
codegen_flags: <defaults>
</compile_context>

<pallas_src>
import jax
import jax.numpy as jnp
from jax.experimental import pallas as pl
from jax.experimental.pallas import tpu as pltpu


# ----------------------------- Fused Pallas kernel -----------------------------


def make_fused_lstm_kernel(nlayers, hidden_size):
    """Build a kernel that runs all nlayers in one invocation.

    Ref order:
      x, h0, c0,
      w1_blk, b1_cat, w2_cat, b2_sum,          # layer 0 (fused small_cell pair)
      [w_cat_i, b_sum_i] * (nlayers - 1),      # layers > 0 (fused ih/hh Linear)
      hy, cy                                   # outputs, (nlayers, B, H) each
    """
    H = hidden_size

    def kernel(*refs):
        x_ref, h0_ref, c0_ref = refs[0], refs[1], refs[2]
        hy_ref, cy_ref = refs[-2], refs[-1]
        w_refs = refs[3:-2]

        inp = x_ref[...]
        for i in range(nlayers):  # trace-time unroll; everything stays in VMEM/vregs
            hx = h0_ref[i]
            cx = c0_ref[i]
            cat = jnp.concatenate([inp, hx], axis=1)

            if i == 0:
                # small_cell(input) + small_cell(hidden), fused:
                #   stage 1: block-diagonal weight -> both ReLU branches in one dot
                #   stage 2: concatenated weight   -> g_ih + g_hh in one dot
                w1 = w_refs[0][...]
                b1 = w_refs[1][...]
                w2 = w_refs[2][...]
                b2 = w_refs[3][...]
                h12 = jnp.maximum(
                    jnp.dot(cat, w1, preferred_element_type=jnp.float32) + b1, 0.0)
                gates = jnp.dot(h12, w2, preferred_element_type=jnp.float32) + b2
            else:
                w = w_refs[4 + 2 * (i - 1)][...]
                b = w_refs[4 + 2 * (i - 1) + 1][...]
                gates = jnp.dot(cat, w, preferred_element_type=jnp.float32) + b

            # gate elementwise math in f32 (EUP/VPU), exactly as the torch code
            i_g = jax.nn.sigmoid(gates[:, 0 * H:1 * H])
            f_g = jax.nn.sigmoid(gates[:, 1 * H:2 * H])
            c_g = jnp.tanh(gates[:, 2 * H:3 * H])
            o_g = jax.nn.sigmoid(gates[:, 3 * H:4 * H])

            ncx = f_g * cx + i_g * c_g
            nhx = o_g * jax.nn.sigmoid(ncx)  # sigmoid(ncx): mirrors the torch source

            cy_ref[i] = ncx
            hy_ref[i] = nhx
            inp = nhx  # dropout == identity (eval mode)

    return kernel


def _vmem_spec():
    return pl.BlockSpec(memory_space=pltpu.MemorySpace.VMEM)


def lstm_cell_forward_fused(x, hidden, fused_params, hidden_size):
    """Single pallas_call for the whole LSTMCell forward."""
    h0, c0 = hidden
    nlayers, B, H = h0.shape
    assert H == hidden_size

    kernel = make_fused_lstm_kernel(nlayers, hidden_size)
    n_in = 3 + len(fused_params)
    out_shape = (jax.ShapeDtypeStruct((nlayers, B, H), jnp.float32),
                 jax.ShapeDtypeStruct((nlayers, B, H), jnp.float32))

    hy, cy = pl.pallas_call(
        kernel,
        out_shape=out_shape,
        in_specs=[_vmem_spec() for _ in range(n_in)],
        out_specs=(_vmem_spec(), _vmem_spec()),
    )(x, h0, c0, *fused_params)
    return hy, cy


# ----------------------------- Parameter setup -----------------------------


def _linear_params(key, in_f, out_f):
    """PyTorch nn.Linear default init: U(-1/sqrt(in), 1/sqrt(in)).
    Returned weight is already transposed to (in, out)."""
    kw, kb = jax.random.split(key)
    bound = 1.0 / jnp.sqrt(jnp.float32(in_f))
    w = jax.random.uniform(kw, (in_f, out_f), jnp.float32, -bound, bound)
    b = jax.random.uniform(kb, (1, out_f), jnp.float32, -bound, bound)
    return w, b


def init_lstm_cell_params(key, input_size, hidden_size, nlayers):
    params = []
    keys = jax.random.split(key, nlayers * 4)
    # layer 0: small_cell on both paths
    wi1, bi1 = _linear_params(keys[0], input_size, input_size // 4)
    wi2, bi2 = _linear_params(keys[1], input_size // 4, 4 * hidden_size)
    wh1, bh1 = _linear_params(keys[2], hidden_size, hidden_size // 4)
    wh2, bh2 = _linear_params(keys[3], hidden_size // 4, 4 * hidden_size)
    params.append(dict(wi1=wi1, bi1=bi1, wi2=wi2, bi2=bi2,
                       wh1=wh1, bh1=bh1, wh2=wh2, bh2=bh2))
    # layers > 0: plain Linear on both paths
    for i in range(1, nlayers):
        wih, bih = _linear_params(keys[4 * i + 0], hidden_size, 4 * hidden_size)
        whh, bhh = _linear_params(keys[4 * i + 1], hidden_size, 4 * hidden_size)
        params.append(dict(wih=wih, bih=bih, whh=whh, bhh=bhh))
    return params


def prepare_fused_params(params, input_size, hidden_size):
    """One-time pre-fusion of the ih/hh weight pairs (done once, outside the hot path).

    layer 0:  stage-1 block-diag weight + concat bias, stage-2 concat weight + summed bias
    layer >0: concat([W_ih; W_hh]) along K and summed bias
    """
    H = hidden_size
    in_q, h_q = input_size // 4, H // 4
    p0 = params[0]

    w1_blk = jnp.zeros((input_size + H, in_q + h_q), jnp.float32)
    w1_blk = w1_blk.at[:input_size, :in_q].set(p0["wi1"])
    w1_blk = w1_blk.at[input_size:, in_q:].set(p0["wh1"])
    b1_cat = jnp.concatenate([p0["bi1"], p0["bh1"]], axis=1)
    w2_cat = jnp.concatenate([p0["wi2"], p0["wh2"]], axis=0)
    b2_sum = p0["bi2"] + p0["bh2"]

    fused = [w1_blk, b1_cat, w2_cat, b2_sum]
    for i in range(1, len(params)):
        p = params[i]
        fused.append(jnp.concatenate([p["wih"], p["whh"]], axis=0))
        fused.append(p["bih"] + p["bhh"])
    return fused


# ----------------------------- Pure-JAX reference -----------------------------


def lstm_cell_forward_ref(x, hidden, params, hidden_size):
    """Pure-JAX reference (unfused, mirrors the torch module) for correctness checks."""
    h0, c0 = hidden
    nlayers = h0.shape[0]
    hy, cy = [], []
    inp = x
    for i in range(nlayers):
        hx, cx = h0[i], c0[i]
        p = params[i]
        if i == 0:
            g_ih = jnp.maximum(inp @ p["wi1"] + p["bi1"], 0.0) @ p["wi2"] + p["bi2"]
            g_hh = jnp.maximum(hx @ p["wh1"] + p["bh1"], 0.0) @ p["wh2"] + p["bh2"]
        else:
            g_ih = inp @ p["wih"] + p["bih"]
            g_hh = hx @ p["whh"] + p["bhh"]
        gates = g_ih + g_hh
        H = hidden_size
        i_g = jax.nn.sigmoid(gates[:, 0 * H:1 * H])
        f_g = jax.nn.sigmoid(gates[:, 1 * H:2 * H])
        c_g = jnp.tanh(gates[:, 2 * H:3 * H])
        o_g = jax.nn.sigmoid(gates[:, 3 * H:4 * H])
        ncx = f_g * cx + i_g * c_g
        nhx = o_g * jax.nn.sigmoid(ncx)
        hy.append(nhx)
        cy.append(ncx)
        inp = nhx
    return jnp.stack(hy, 0), jnp.stack(cy, 0)


# ----------------------------- Main -----------------------------

if __name__ == "__main__":
    B = 2
    INPUT_SIZE = 64
    HIDDEN_SIZE = 32
    NLAYERS = 2

    key = jax.random.PRNGKey(0)
    k_par, k_x, k_h, k_c = jax.random.split(key, 4)

    params = init_lstm_cell_params(k_par, INPUT_SIZE, HIDDEN_SIZE, NLAYERS)
    fused_params = prepare_fused_params(params, INPUT_SIZE, HIDDEN_SIZE)

    x = jax.random.normal(k_x, (B, INPUT_SIZE), jnp.float32)
    h0 = jax.random.normal(k_h, (NLAYERS, B, HIDDEN_SIZE), jnp.float32)
    c0 = jax.random.normal(k_c, (NLAYERS, B, HIDDEN_SIZE), jnp.float32)

    hy, cy = lstm_cell_forward_fused(x, (h0, c0), fused_params, HIDDEN_SIZE)
    hy, cy = jax.block_until_ready((hy, cy))

    hy_ref, cy_ref = lstm_cell_forward_ref(x, (h0, c0), params, HIDDEN_SIZE)

    assert hy.shape == (NLAYERS, B, HIDDEN_SIZE)
    assert cy.shape == (NLAYERS, B, HIDDEN_SIZE)
    # Fused matmuls reassociate the g_ih + g_hh accumulation; allow f32 rounding slack.
    assert jnp.allclose(hy, hy_ref, atol=1e-4, rtol=1e-4)
    assert jnp.allclose(cy, cy_ref, atol=1e-4, rtol=1e-4)

    print("KERNEL_OK")
</pallas_src>

<mosaic_0001>
module attributes {stable_mosaic.version = 11 : i64} {
  func.func @kernel(%arg0: memref<2x64xf32, #tpu.memory_space<vmem>>, %arg1: memref<2x2x32xf32, #tpu.memory_space<vmem>>, %arg2: memref<2x2x32xf32, #tpu.memory_space<vmem>>, %arg3: memref<96x24xf32, #tpu.memory_space<vmem>>, %arg4: memref<1x24xf32, #tpu.memory_space<vmem>>, %arg5: memref<24x128xf32, #tpu.memory_space<vmem>>, %arg6: memref<1x128xf32, #tpu.memory_space<vmem>>, %arg7: memref<64x128xf32, #tpu.memory_space<vmem>>, %arg8: memref<1x128xf32, #tpu.memory_space<vmem>>, %arg9: memref<2x2x32xf32, #tpu.memory_space<vmem>>, %arg10: memref<2x2x32xf32, #tpu.memory_space<vmem>>) attributes {dimension_semantics = [], scalar_prefetch = 0 : i64, scratch_operands = 0 : i64, tpu.core_type = #tpu.core_type<tc>} {
    %c0 = arith.constant 0 : index
    %c0_0 = arith.constant 0 : index
    %0 = vector.load %arg0[%c0, %c0_0] : memref<2x64xf32, #tpu.memory_space<vmem>>, vector<2x64xf32>
    %c0_1 = arith.constant 0 : index
    %c0_2 = arith.constant 0 : index
    %c0_3 = arith.constant 0 : index
    %1 = vector.load %arg1[%c0_1, %c0_2, %c0_3] : memref<2x2x32xf32, #tpu.memory_space<vmem>>, vector<1x2x32xf32>
    %2 = vector.shape_cast %1 : vector<1x2x32xf32> to vector<2x32xf32>
    %c0_4 = arith.constant 0 : index
    %c0_5 = arith.constant 0 : index
    %c0_6 = arith.constant 0 : index
    %3 = vector.load %arg2[%c0_4, %c0_5, %c0_6] : memref<2x2x32xf32, #tpu.memory_space<vmem>>, vector<1x2x32xf32>
    %4 = vector.shape_cast %3 : vector<1x2x32xf32> to vector<2x32xf32>
    %5 = tpu.concatenate %0, %2 in 1 : vector<2x64xf32>, vector<2x32xf32> -> vector<2x96xf32>
    %c0_7 = arith.constant 0 : index
    %c0_8 = arith.constant 0 : index
    %6 = vector.load %arg3[%c0_7, %c0_8] : memref<96x24xf32, #tpu.memory_space<vmem>>, vector<96x24xf32>
    %c0_9 = arith.constant 0 : index
    %c0_10 = arith.constant 0 : index
    %7 = vector.load %arg4[%c0_9, %c0_10] : memref<1x24xf32, #tpu.memory_space<vmem>>, vector<1x24xf32>
    %c0_11 = arith.constant 0 : index
    %c0_12 = arith.constant 0 : index
    %8 = vector.load %arg5[%c0_11, %c0_12] : memref<24x128xf32, #tpu.memory_space<vmem>>, vector<24x128xf32>
    %c0_13 = arith.constant 0 : index
    %c0_14 = arith.constant 0 : index
    %9 = vector.load %arg6[%c0_13, %c0_14] : memref<1x128xf32, #tpu.memory_space<vmem>>, vector<1x128xf32>
    %cst = arith.constant dense<0.000000e+00> : vector<2x24xf32>
    %10 = tpu.matmul %5, %6, %cst {dimension_numbers = #tpu.dot_dimension_numbers<[1], [0], [0], [1], [0, 0, 1, 1], [], []>} : vector<2x96xf32>, vector<96x24xf32>, vector<2x24xf32> -> vector<2x24xf32>
    %11 = vector.broadcast %7 : vector<1x24xf32> to vector<2x24xf32>
    %12 = arith.addf %10, %11 : vector<2x24xf32>
    %cst_15 = arith.constant 0.000000e+00 : f32
    %13 = vector.broadcast %cst_15 : f32 to vector<2x24xf32>
    %14 = arith.maximumf %12, %13 : vector<2x24xf32>
    %cst_16 = arith.constant dense<0.000000e+00> : vector<2x128xf32>
    %15 = tpu.matmul %14, %8, %cst_16 {dimension_numbers = #tpu.dot_dimension_numbers<[1], [0], [0], [1], [0, 0, 1, 1], [], []>} : vector<2x24xf32>, vector<24x128xf32>, vector<2x128xf32> -> vector<2x128xf32>
    %16 = vector.broadcast %9 : vector<1x128xf32> to vector<2x128xf32>
    %17 = arith.addf %15, %16 : vector<2x128xf32>
    %18 = vector.extract_strided_slice %17 {offsets = [0, 0], sizes = [2, 32], strides = [1, 1]} : vector<2x128xf32> to vector<2x32xf32>
    %19 = arith.negf %18 : vector<2x32xf32>
    %20 = math.exp %19 : vector<2x32xf32>
    %cst_17 = arith.constant 1.000000e+00 : f32
    %21 = vector.broadcast %cst_17 : f32 to vector<2x32xf32>
    %22 = arith.addf %21, %20 : vector<2x32xf32>
    %23 = arith.divf %21, %22 : vector<2x32xf32>
    %24 = vector.extract_strided_slice %17 {offsets = [0, 32], sizes = [2, 32], strides = [1, 1]} : vector<2x128xf32> to vector<2x32xf32>
    %25 = arith.negf %24 : vector<2x32xf32>
    %26 = math.exp %25 : vector<2x32xf32>
    %cst_18 = arith.constant 1.000000e+00 : f32
    %27 = vector.broadcast %cst_18 : f32 to vector<2x32xf32>
    %28 = arith.addf %27, %26 : vector<2x32xf32>
    %29 = arith.divf %27, %28 : vector<2x32xf32>
    %30 = vector.extract_strided_slice %17 {offsets = [0, 64], sizes = [2, 32], strides = [1, 1]} : vector<2x128xf32> to vector<2x32xf32>
    %31 = math.tanh %30 : vector<2x32xf32>
    %32 = vector.extract_strided_slice %17 {offsets = [0, 96], sizes = [2, 32], strides = [1, 1]} : vector<2x128xf32> to vector<2x32xf32>
    %33 = arith.negf %32 : vector<2x32xf32>
    %34 = math.exp %33 : vector<2x32xf32>
    %cst_19 = arith.constant 1.000000e+00 : f32
    %35 = vector.broadcast %cst_19 : f32 to vector<2x32xf32>
    %36 = arith.addf %35, %34 : vector<2x32xf32>
    %37 = arith.divf %35, %36 : vector<2x32xf32>
    %38 = arith.mulf %29, %4 : vector<2x32xf32>
    %39 = arith.mulf %23, %31 : vector<2x32xf32>
    %40 = arith.addf %38, %39 : vector<2x32xf32>
    %41 = arith.negf %40 : vector<2x32xf32>
    %42 = math.exp %41 : vector<2x32xf32>
    %cst_20 = arith.constant 1.000000e+00 : f32
    %43 = vector.broadcast %cst_20 : f32 to vector<2x32xf32>
    %44 = arith.addf %43, %42 : vector<2x32xf32>
    %45 = arith.divf %43, %44 : vector<2x32xf32>
    %46 = arith.mulf %37, %45 : vector<2x32xf32>
    %c0_21 = arith.constant 0 : index
    %c0_22 = arith.constant 0 : index
    %c0_23 = arith.constant 0 : index
    %47 = vector.load %arg10[%c0_21, %c0_22, %c0_23] : memref<2x2x32xf32, #tpu.memory_space<vmem>>, vector<1x2x32xf32>
    %48 = vector.shape_cast %47 : vector<1x2x32xf32> to vector<2x32xf32>
    %49 = vector.shape_cast %40 : vector<2x32xf32> to vector<1x2x32xf32>
    tpu.vector_store %arg10[%c0_21, %c0_22, %c0_23], %49 {strides = array<i32>} : memref<2x2x32xf32, #tpu.memory_space<vmem>>, vector<1x2x32xf32>,
    %c0_24 = arith.constant 0 : index
    %c0_25 = arith.constant 0 : index
    %c0_26 = arith.constant 0 : index
    %50 = vector.load %arg9[%c0_24, %c0_25, %c0_26] : memref<2x2x32xf32, #tpu.memory_space<vmem>>, vector<1x2x32xf32>
    %51 = vector.shape_cast %50 : vector<1x2x32xf32> to vector<2x32xf32>
    %52 = vector.shape_cast %46 : vector<2x32xf32> to vector<1x2x32xf32>
    tpu.vector_store %arg9[%c0_24, %c0_25, %c0_26], %52 {strides = array<i32>} : memref<2x2x32xf32, #tpu.memory_space<vmem>>, vector<1x2x32xf32>,
    %c1 = arith.constant 1 : index
    %c0_27 = arith.constant 0 : index
    %c0_28 = arith.constant 0 : index
    %53 = vector.load %arg1[%c1, %c0_27, %c0_28] : memref<2x2x32xf32, #tpu.memory_space<vmem>>, vector<1x2x32xf32>
    %54 = vector.shape_cast %53 : vector<1x2x32xf32> to vector<2x32xf32>
    %c1_29 = arith.constant 1 : index
    %c0_30 = arith.constant 0 : index
    %c0_31 = arith.constant 0 : index
    %55 = vector.load %arg2[%c1_29, %c0_30, %c0_31] : memref<2x2x32xf32, #tpu.memory_space<vmem>>, vector<1x2x32xf32>
    %56 = vector.shape_cast %55 : vector<1x2x32xf32> to vector<2x32xf32>
    %57 = tpu.concatenate %46, %54 in 1 : vector<2x32xf32>, vector<2x32xf32> -> vector<2x64xf32>
    %c0_32 = arith.constant 0 : index
    %c0_33 = arith.constant 0 : index
    %58 = vector.load %arg7[%c0_32, %c0_33] : memref<64x128xf32, #tpu.memory_space<vmem>>, vector<64x128xf32>
    %c0_34 = arith.constant 0 : index
    %c0_35 = arith.constant 0 : index
    %59 = vector.load %arg8[%c0_34, %c0_35] : memref<1x128xf32, #tpu.memory_space<vmem>>, vector<1x128xf32>
    %cst_36 = arith.constant dense<0.000000e+00> : vector<2x128xf32>
    %60 = tpu.matmul %57, %58, %cst_36 {dimension_numbers = #tpu.dot_dimension_numbers<[1], [0], [0], [1], [0, 0, 1, 1], [], []>} : vector<2x64xf32>, vector<64x128xf32>, vector<2x128xf32> -> vector<2x128xf32>
    %61 = vector.broadcast %59 : vector<1x128xf32> to vector<2x128xf32>
    %62 = arith.addf %60, %61 : vector<2x128xf32>
    %63 = vector.extract_strided_slice %62 {offsets = [0, 0], sizes = [2, 32], strides = [1, 1]} : vector<2x128xf32> to vector<2x32xf32>
    %64 = arith.negf %63 : vector<2x32xf32>
    %65 = math.exp %64 : vector<2x32xf32>
    %cst_37 = arith.constant 1.000000e+00 : f32
    %66 = vector.broadcast %cst_37 : f32 to vector<2x32xf32>
    %67 = arith.addf %66, %65 : vector<2x32xf32>
    %68 = arith.divf %66, %67 : vector<2x32xf32>
    %69 = vector.extract_strided_slice %62 {offsets = [0, 32], sizes = [2, 32], strides = [1, 1]} : vector<2x128xf32> to vector<2x32xf32>
    %70 = arith.negf %69 : vector<2x32xf32>
    %71 = math.exp %70 : vector<2x32xf32>
    %cst_38 = arith.constant 1.000000e+00 : f32
    %72 = vector.broadcast %cst_38 : f32 to vector<2x32xf32>
    %73 = arith.addf %72, %71 : vector<2x32xf32>
    %74 = arith.divf %72, %73 : vector<2x32xf32>
    %75 = vector.extract_strided_slice %62 {offsets = [0, 64], sizes = [2, 32], strides = [1, 1]} : vector<2x128xf32> to vector<2x32xf32>
    %76 = math.tanh %75 : vector<2x32xf32>
    %77 = vector.extract_strided_slice %62 {offsets = [0, 96], sizes = [2, 32], strides = [1, 1]} : vector<2x128xf32> to vector<2x32xf32>
    %78 = arith.negf %77 : vector<2x32xf32>
    %79 = math.exp %78 : vector<2x32xf32>
    %cst_39 = arith.constant 1.000000e+00 : f32
    %80 = vector.broadcast %cst_39 : f32 to vector<2x32xf32>
    %81 = arith.addf %80, %79 : vector<2x32xf32>
    %82 = arith.divf %80, %81 : vector<2x32xf32>
    %83 = arith.mulf %74, %56 : vector<2x32xf32>
    %84 = arith.mulf %68, %76 : vector<2x32xf32>
    %85 = arith.addf %83, %84 : vector<2x32xf32>
    %86 = arith.negf %85 : vector<2x32xf32>
    %87 = math.exp %86 : vector<2x32xf32>
    %cst_40 = arith.constant 1.000000e+00 : f32
    %88 = vector.broadcast %cst_40 : f32 to vector<2x32xf32>
    %89 = arith.addf %88, %87 : vector<2x32xf32>
    %90 = arith.divf %88, %89 : vector<2x32xf32>
    %91 = arith.mulf %82, %90 : vector<2x32xf32>
    %c1_41 = arith.constant 1 : index
    %c0_42 = arith.constant 0 : index
    %c0_43 = arith.constant 0 : index
    %92 = vector.load %arg10[%c1_41, %c0_42, %c0_43] : memref<2x2x32xf32, #tpu.memory_space<vmem>>, vector<1x2x32xf32>
    %93 = vector.shape_cast %92 : vector<1x2x32xf32> to vector<2x32xf32>
    %94 = vector.shape_cast %85 : vector<2x32xf32> to vector<1x2x32xf32>
    tpu.vector_store %arg10[%c1_41, %c0_42, %c0_43], %94 {strides = array<i32>} : memref<2x2x32xf32, #tpu.memory_space<vmem>>, vector<1x2x32xf32>,
    %c1_44 = arith.constant 1 : index
    %c0_45 = arith.constant 0 : index
    %c0_46 = arith.constant 0 : index
    %95 = vector.load %arg9[%c1_44, %c0_45, %c0_46] : memref<2x2x32xf32, #tpu.memory_space<vmem>>, vector<1x2x32xf32>
    %96 = vector.shape_cast %95 : vector<1x2x32xf32> to vector<2x32xf32>
    %97 = vector.shape_cast %91 : vector<2x32xf32> to vector<1x2x32xf32>
    tpu.vector_store %arg9[%c1_44, %c0_45, %c0_46], %97 {strides = array<i32>} : memref<2x2x32xf32, #tpu.memory_space<vmem>>, vector<1x2x32xf32>,
    return
  }
}

</mosaic_0001>

<bundles_post_ra>
// kernel: tpu_custom_call.1
= control target key start
LH: loop header
LB: loop body
LE: loop exit
PB: predicated region body
PF: predicated region fallthrough
CT: control target
= control target key end

     0   :  { %16 = vsyncpa [#allocation3], 0  ;;  %s429_s19 = smov 64   ;;  %s613_s0 = inlined_call_operand.vmem [shape: f32[2,64], index: 0, kind: input, shape index: {}]   ;;  %s614_s1 = inlined_call_operand.vmem [shape: f32[2,2,32], index: 1, kind: input, shape index: {}]   ;;  %s615_s2 = inlined_call_operand.vmem [shape: f32[2,2,32], index: 2, kind: input, shape index: {}]   ;;  %s616_s3 = inlined_call_operand.vmem [shape: f32[96,24], index: 3, kind: input, shape index: {}]   ;;  %s617_s4 = inlined_call_operand.vmem [shape: f32[1,24], index: 4, kind: input, shape index: {}]   ;;  %s618_s5 = inlined_call_operand.vmem [shape: f32[24,128], index: 5, kind: input, shape index: {}]   ;;  %s619_s6 = inlined_call_operand.vmem [shape: f32[1,128], index: 6, kind: input, shape index: {}]   ;;  %s620_s7 = inlined_call_operand.vmem [shape: f32[64,128], index: 7, kind: input, shape index: {}]   ;;  %s621_s8 = inlined_call_operand.vmem [shape: f32[1,128], index: 8, kind: input, shape index: {}]   ;;  %s622_s9 = inlined_call_operand.hbm [shape: f32[2,2,32], index: 9, kind: output, shape index: {0}]   ;;  %s623_s10 = inlined_call_operand.hbm [shape: f32[2,2,32], index: 10, kind: output, shape index: {1}]  }
   0x1   :  { %v37_v0 = vld [vmem:[%s614_s1] sm:$0x3]  ;;  %v56_v1 = vld [vmem:[%s616_s3 + $0x58] sm:$0xff]  ;;  %v55_v2 = vld [vmem:[%s616_s3 + $0x50] sm:$0xff] }
   0x2   :  { %40 = vrot.lane.b32.xlu0 %v37_v0, %s429_s19  ;;  %73 = vmatpush.msra.mxu0 %v56_v1  ;;  %v54_v3 = vld [vmem:[%s616_s3 + $0x48] sm:$0xff]  ;;  %v53_v4 = vld [vmem:[%s616_s3 + $0x40] sm:$0xff] }
   0x4   :  { %74 = vmatpush.msra.mxu0 %v55_v2 }
   0x6   :  { %75 = vmatpush.msra.mxu0 %v54_v3 }
   0x7   :  { %17 = vsyncpa [#allocation5], 0  ;;  %v52_v5 = vld [vmem:[%s616_s3 + $0x38] sm:$0xff]  ;;  %v51_v6 = vld [vmem:[%s616_s3 + $0x30] sm:$0xff]  ;;  %vm43_vm0 = vcmask 523264   ;;  %vm65_vm1 = vcmask 785408  }
   0x8   :  { %76 = vmatpush.msra.mxu0 %v53_v4  ;;  %v50_v7 = vld [vmem:[%s616_s3 + $0x28] sm:$0xff]  ;;  %v49_v8 = vld [vmem:[%s616_s3 + $0x20] sm:$0xff]  ;;  %v48_v9 = vld [vmem:[%s616_s3 + $0x18] sm:$0xff]  ;;  %s430_s29 = smov 32   ;;  %vm93_vm2 = vcmask 195584   ;;  %vm180_vm11 = vcmask 254976  }
   0x9   :  { %v47_v10 = vld [vmem:[%s616_s3 + $0x10] sm:$0xff]  ;;  %v46_v11 = vld [vmem:[%s616_s3 + $0x8] sm:$0xff]  ;;  %v45_v12 = vld [vmem:[%s616_s3] sm:$0xff]  ;;  %vm195_vm12 = vcmask 261120   ;;  %s309_s15 = sshll.u32 %s622_s9, 4  ;;  %s310_s15 = int_to_ptr.hbm [resolvable:$true] %s309_s15 }
   0xa   :  { %77 = vmatpush.msra.mxu0 %v52_v5  ;;  %v36_v13 = vld [vmem:[%s613_s0] sm:$0x3]  ;;  %v60_v16 = vld [vmem:[%s618_s5 + $0x10] sm:$0xff]  ;;  %v59_v17 = vld [vmem:[%s618_s5 + $0x8] sm:$0xff]  ;;  %s431_s0 = smov 96  }
   0xb   :  { %110 = vmatpush.msra.mxu1 %v60_v16  ;;  %v58_v18 = vld [vmem:[%s618_s5] sm:$0xff]  ;;  %v204_v61 = vld [vmem:[%s620_s7 + $0x38] sm:$0xff]  ;;  %v203_v62 = vld [vmem:[%s620_s7 + $0x30] sm:$0xff]  ;;  %s433_s5 = smov 2  }
   0xc   :  { %78 = vmatpush.msra.mxu0 %v51_v6  ;;  %v38_v19 = vld [vmem:[%s615_s2] sm:$0x3]  ;;  %v343_v45 = vld [vmem:[%s614_s1 + $0x2] sm:$0x3]  ;;  %220 = vmatpush.msra.mxu2 %v204_v61  ;;  %v202_v63 = vld [vmem:[%s620_s7 + $0x28] sm:$0xff] }
   0xd   :  { %111 = vmatpush.msra.mxu1 %v59_v17  ;;  %138 = vrot.lane.b32.xlu1 %v38_v19, %s430_s29  ;;  %v354_v20 = vld [vmem:[%s617_s4] ss:$0 sm:$0xff]  ;;  %v200_v1 = vld [vmem:[%s620_s7 + $0x18] sm:$0xff]  ;;  %v199_v2 = vld [vmem:[%s620_s7 + $0x10] sm:$0xff]  ;;  %s322_s4 = sshll.u32 %s623_s10, 4  ;;  %s323_s4 = int_to_ptr.hbm [resolvable:$true] %s322_s4 }
   0xe   :  { %79 = vmatpush.msra.mxu0 %v50_v7  ;;  %v355_v24 = vld [vmem:[%s619_s6] ss:$0 sm:$0xff]  ;;  %221 = vmatpush.msra.mxu2 %v203_v62  ;;  %v198_v3 = vld [vmem:[%s620_s7 + $0x8] sm:$0xff]  ;;  %v344_v6 = vld [vmem:[%s615_s2 + $0x2] sm:$0x3] }
   0xf   :  { %112 = vmatpush.msra.mxu1 %v58_v18  ;;  %v201_v0 = vld [vmem:[%s620_s7 + $0x20] sm:$0xff] }
  0x10   :  { %80 = vmatpush.msra.mxu0 %v49_v8  ;;  %222 = vmatpush.msra.mxu2 %v202_v63  ;;  %v197_v7 = vld [vmem:[%s620_s7] sm:$0xff]  ;;  %s432_s7 = smov [#allocation4]  }
  0x12   :  { %81 = vmatpush.msra.mxu0 %v48_v9  ;;  %223 = vmatpush.msra.mxu2 %v201_v0 }
  0x14   :  { %82 = vmatpush.msra.mxu0 %v47_v10  ;;  %224 = vmatpush.msra.mxu2 %v200_v1 }
  0x16   :  { %83 = vmatpush.msra.mxu0 %v46_v11  ;;  %225 = vmatpush.msra.mxu2 %v199_v2 }
  0x18   :  { %84 = vmatpush.msra.mxu0 %v45_v12  ;;  %226 = vmatpush.msra.mxu2 %v198_v3 }
  0x1a   :  { %227 = vmatpush.msra.mxu2 %v197_v7 }
  0x74   :  { %v41_v14 = vpop.permute.xlu0 %40 }
  0x75   :  { %v44_v15 = vsel %vm43_vm0, %v36_v13, %v41_v14  ;;  %v356_v13 = vld [vmem:[%s621_s8] ss:$0 sm:$0xff]  ;;  %s320_s8 = sshll.u32 %s432_s7, 4  ;;  %s321_s8 = int_to_ptr.vmem [resolvable:$true] %s320_s8 }
  0x76   :  { %339 = vmatmul.msk.f32.vlgmr.msra.gmra.mxu0 %vm65_vm1, %v44_v15 }
  0x7f   :  { %v139_v43 = vpop.permute.xlu1 %138 }
  0xf3   :  { %v86_v21 = vpop.f32.mrf.mxu0 }
  0xf4   :  { %v87_v22 = vadd.f32 %v354_v20, %v86_v21 }
  0xf6   :  { %v89_v23 = vmax.f32 %v87_v22, 0.0 }
  0xf8   :  { %340 = vmatmul.msk.f32.vlgmr.msra.gmra.mxu1 %vm93_vm2, %v89_v23 }
 0x175   :  { %v114_v25 = vpop.f32.mrf.mxu1 }
 0x176   :  { %v115_v26 = vadd.f32 %v355_v24, %v114_v25 }
 0x178   :  { %357 = vtanh.f32 %v115_v26  ;;  %v341_v28 = vmul.f32 -1.442695, %v115_v26 }
 0x17a   :  { %359 = vpow2.f32 %v341_v28 }
 0x17e   :  { %v358_v27 = vpop.eup %357 }
 0x17f   :  { %143 = vrot.lane.b32.xlu0 %v358_v27, %s429_s19 }
 0x180   :  { %v360_v29 = vpop.eup %359 }
 0x181   :  { %v120_v30 = vadd.f32 1.0, %v360_v29 }
 0x183   :  { %361 = vrcp.f32 %v120_v30  ;;  %v132_v36 = vand.u32 2147483648, %v120_v30  ;;  %vm126_vm4 = vweird.f32 %v120_v30  ;;  %v130_v37 = vand.u32 2147483647, %v120_v30 }
 0x185   :  { %v133_v39 = vor.u32 1.1754944e-38, %v132_v36  ;;  %vm131_vm6 = vcmp.eq.f32.partialorder %v130_v37, 8.507059e+37 }
 0x187   :  { %192 = vrot.lane.b32.xlu0 %v343_v45, %s430_s29 }
 0x189   :  { %v362_v31 = vpop.eup %361 }
 0x18a   :  { %v122_v32 = vmul.f32 %v362_v31, %v120_v30  ;;  %vm127_vm3 = vweird.f32 %v362_v31 }
 0x18b   :  { %vm128_vm5 = vmor %vm126_vm4, %vm127_vm3 }
 0x18c   :  { %v123_v33 = vsub.f32 1.0, %v122_v32 }
 0x18e   :  { %v124_v34 = vmul.f32 %v362_v31, %v123_v33 }
 0x190   :  { %v125_v35 = vadd.f32 %v362_v31, %v124_v34 }
 0x192   :  { %v129_v38 = vsel %vm128_vm5, %v362_v31, %v125_v35 }
 0x193   :  { %v134_v40 = vsel %vm131_vm6, %v133_v39, %v129_v38 }
 0x194   :  { %v141_v44 = vmul.f32 %v139_v43, %v134_v40 }
 0x1f1   :  { %v144_v41 = vpop.permute.xlu0 %143 }
 0x1f2   :  { %v146_v42 = vmul.f32 %v144_v41, %v134_v40 }
 0x1f4   :  { %148 = vrot.lane.b32.xlu1 %v146_v42, %s430_s29 }
 0x1f9   :  { %v193_v8 = vpop.permute.xlu0 %192 }
 0x266   :  { %v149_v46 = vpop.permute.xlu1 %148 }
 0x267   :  { %v151_v47 = vadd.f32 %v149_v46, %v141_v44 }
 0x269   :  { %v342_v48 = vmul.f32 -1.442695, %v151_v47 }
 0x26b   :  { %363 = vpow2.f32 %v342_v48 }
 0x271   :  { %v364_v49 = vpop.eup %363 }
 0x272   :  { %v155_v50 = vadd.f32 1.0, %v364_v49 }
 0x274   :  { %365 = vrcp.f32 %v155_v50  ;;  %v167_v54 = vand.u32 2147483648, %v155_v50  ;;  %v165_v56 = vand.u32 2147483647, %v155_v50  ;;  %vm161_vm8 = vweird.f32 %v155_v50 }
 0x276   :  { %v168_v58 = vor.u32 1.1754944e-38, %v167_v54  ;;  %vm166_vm10 = vcmp.eq.f32.partialorder %v165_v56, 8.507059e+37 }
 0x27a   :  { %v366_v51 = vpop.eup %365 }
 0x27b   :  { %v157_v52 = vmul.f32 %v366_v51, %v155_v50  ;;  %vm162_vm7 = vweird.f32 %v366_v51 }
 0x27c   :  { %vm163_vm9 = vmor %vm161_vm8, %vm162_vm7 }
 0x27d   :  { %v158_v53 = vsub.f32 1.0, %v157_v52 }
 0x27f   :  { %v159_v55 = vmul.f32 %v366_v51, %v158_v53 }
 0x281   :  { %v160_v57 = vadd.f32 %v366_v51, %v159_v55 }
 0x283   :  { %v164_v59 = vsel %vm163_vm9, %v366_v51, %v160_v57 }
 0x284   :  { %v169_v60 = vsel %vm166_vm10, %v168_v58, %v164_v59 }
 0x285   :  { %172 = vrot.lane.b32.xlu2 %v169_v60, %s429_s19 }
 0x2df   :  { %v173_v4 = vpop.permute.xlu2 %172 }
 0x2e0   :  { %v175_v5 = vmul.f32 %v173_v4, %v134_v40 }
 0x2e2   :  { %183 = vrot.lane.b32.xlu2 %v175_v5, %s430_s29 }
 0x2ea   :  { %253 = vrot.lane.b32.xlu2 %v344_v6, %s430_s29 }
 0x2f2   :  { %177 = vrot.lane.b32.xlu2 %v151_v47, %s431_s0 }
 0x33c   :  { %v184_v9 = vpop.permute.xlu2 %183 }
 0x33d   :  { %186 = vst.msk [vmem:[#allocation2] sm:$0x3] %vm180_vm11, %v184_v9  ;;  %v196_v10 = vsel %vm195_vm12, %v184_v9, %v193_v8 }
 0x33e   :  { %345 = vmatmul.msk.f32.vlgmr.msra.gmra.mxu2 %vm43_vm0, %v196_v10 }
 0x344   :  { %v254_v11 = vpop.permute.xlu2 %253 }
 0x34c   :  { %v178_v12 = vpop.permute.xlu2 %177 }
 0x34d   :  { %181 = vst.msk [vmem:[#allocation4] sm:$0x3] %vm180_vm11, %v178_v12 }
 0x3c1   :  { %v229_v14 = vpop.f32.mrf.mxu2 }
 0x3c2   :  { %v230_v15 = vadd.f32 %v356_v13, %v229_v14 }
 0x3c4   :  { %367 = vtanh.f32 %v230_v15  ;;  %v346_v17 = vmul.f32 -1.442695, %v230_v15 }
 0x3c6   :  { %369 = vpow2.f32 %v346_v17 }
 0x3ca   :  { %v368_v16 = vpop.eup %367 }
 0x3cb   :  { %258 = vrot.lane.b32.xlu1 %v368_v16, %s429_s19 }
 0x3cc   :  { %v370_v18 = vpop.eup %369 }
 0x3cd   :  { %v235_v19 = vadd.f32 1.0, %v370_v18 }
 0x3cf   :  { %371 = vrcp.f32 %v235_v19  ;;  %v247_v25 = vand.u32 2147483648, %v235_v19  ;;  %vm241_vm14 = vweird.f32 %v235_v19  ;;  %v245_v26 = vand.u32 2147483647, %v235_v19 }
 0x3d1   :  { %v248_v28 = vor.u32 1.1754944e-38, %v247_v25  ;;  %vm246_vm0 = vcmp.eq.f32.partialorder %v245_v26, 8.507059e+37 }
 0x3d5   :  { %v372_v20 = vpop.eup %371 }
 0x3d6   :  { %v237_v21 = vmul.f32 %v372_v20, %v235_v19  ;;  %vm242_vm13 = vweird.f32 %v372_v20 }
 0x3d7   :  { %vm243_vm15 = vmor %vm241_vm14, %vm242_vm13 }
 0x3d8   :  { %v238_v22 = vsub.f32 1.0, %v237_v21 }
 0x3da   :  { %v239_v23 = vmul.f32 %v372_v20, %v238_v22 }
 0x3dc   :  { %v240_v24 = vadd.f32 %v372_v20, %v239_v23 }
 0x3de   :  { %v244_v27 = vsel %vm243_vm15, %v372_v20, %v240_v24 }
 0x3df   :  { %v249_v30 = vsel %vm246_vm0, %v248_v28, %v244_v27 }
 0x3e0   :  { %v256_v32 = vmul.f32 %v254_v11, %v249_v30 }
 0x43d   :  { %v259_v29 = vpop.permute.xlu1 %258 }
 0x43e   :  { %v261_v31 = vmul.f32 %v259_v29, %v249_v30 }
 0x440   :  { %263 = vrot.lane.b32.xlu0 %v261_v31, %s430_s29 }
 0x4b2   :  { %v264_v33 = vpop.permute.xlu0 %263 }
 0x4b3   :  { %v266_v34 = vadd.f32 %v264_v33, %v256_v32 }
 0x4b5   :  { %v347_v35 = vmul.f32 -1.442695, %v266_v34  ;;  %292 = vrot.lane.b32.xlu0 %v266_v34, %s431_s0 }
 0x4b7   :  { %373 = vpow2.f32 %v347_v35 }
 0x4bd   :  { %v374_v36 = vpop.eup %373 }
 0x4be   :  { %v270_v37 = vadd.f32 1.0, %v374_v36 }
 0x4c0   :  { %375 = vrcp.f32 %v270_v37  ;;  %v282_v41 = vand.u32 2147483648, %v270_v37  ;;  %v280_v43 = vand.u32 2147483647, %v270_v37  ;;  %vm276_vm2 = vweird.f32 %v270_v37 }
 0x4c2   :  { %v283_v45 = vor.u32 1.1754944e-38, %v282_v41  ;;  %vm281_vm4 = vcmp.eq.f32.partialorder %v280_v43, 8.507059e+37 }
 0x4c6   :  { %v376_v38 = vpop.eup %375 }
 0x4c7   :  { %v272_v39 = vmul.f32 %v376_v38, %v270_v37  ;;  %vm277_vm1 = vweird.f32 %v376_v38 }
 0x4c8   :  { %vm278_vm3 = vmor %vm276_vm2, %vm277_vm1 }
 0x4c9   :  { %v273_v40 = vsub.f32 1.0, %v272_v39 }
 0x4cb   :  { %v274_v42 = vmul.f32 %v376_v38, %v273_v40 }
 0x4cd   :  { %v275_v44 = vadd.f32 %v376_v38, %v274_v42 }
 0x4cf   :  { %v279_v46 = vsel %vm278_vm3, %v376_v38, %v275_v44 }
 0x4d0   :  { %v284_v47 = vsel %vm281_vm4, %v283_v45, %v279_v46 }
 0x4d1   :  { %287 = vrot.lane.b32.xlu1 %v284_v47, %s429_s19  ;;  %s434_s19 = smov [#allocation2]  }
 0x4d2   :  { %s307_s1 = sshll.u32 %s434_s19, 4  ;;  %s308_s1 = int_to_ptr.vmem [resolvable:$true] %s307_s1 }
 0x527   :  { %v293_v48 = vpop.permute.xlu0 %292 }
 0x528   :  { %296 = vst.msk [vmem:[#allocation4 + $0x2] sm:$0x3] %vm180_vm11, %v293_v48 }
 0x529   :  { %328 = dma.vmem_to_hbm [thread:$0]  %s321_s8, 64, %s323_s4, [#allocation5], %s430_s29, %s430_s29, %s433_s5  }
 0x543   :  { %v288_v49 = vpop.permute.xlu1 %287 }
 0x544   :  { %v290_v50 = vmul.f32 %v288_v49, %v249_v30 }
 0x546   :  { %298 = vrot.lane.b32.xlu1 %v290_v50, %s430_s29 }
 0x5b8   :  { %v299_v51 = vpop.permute.xlu1 %298 }
 0x5b9   :  { %302 = vst.msk [vmem:[#allocation2 + $0x2] sm:$0x3] %vm180_vm11, %v299_v51 }
 0x5ba   :  { %315 = dma.vmem_to_hbm [thread:$0]  %s308_s1, 64, %s310_s15, [#allocation3], %s430_s29, %s430_s29, %s433_s5  }
 0x5bb   :  { %425 = dma.done.wait [#allocation3], 64  }
 0x5bc   :  { %426 = vsyncadd [#allocation3], 4294967232 }
 0x5bd   :  { %427 = dma.done.wait [#allocation5], 64  }
 0x5be   :  { %428 = vsyncadd [#allocation5], 4294967232 }
 0x5bf   :  { %337 = vsyncpa [#allocation3], 1 }
 0x5c0   :  { %338 = vsyncpa [#allocation5], 1 }

</bundles_post_ra>
